<compile_context>
chip_gen: v7x
topology: tpu7x:2x2x1
jax: 0.10.0
libtpu: 0.0.40
codegen_flags: <defaults>
</compile_context>

<pallas_src>
import functools

import jax
import jax.numpy as jnp
from jax import lax
from jax.experimental import pallas as pl
from jax.experimental.pallas import tpu as pltpu


def _round_up(v, m):
    return (v + m - 1) // m * m


def _vmem_capacity_bytes():
    """Physical VMEM per TensorCore (v5e/v6e: 128 MiB, v7x: 64 MiB)."""
    try:
        cap = int(getattr(pltpu.get_tpu_info(), "vmem_capacity_bytes", 0) or 0)
        if cap > 0:
            return cap
    except Exception:
        pass
    kind = ""
    try:
        kind = jax.devices()[0].device_kind.lower()
    except Exception:
        pass
    if "v5" in kind or "v6" in kind:
        return 128 * 1024 * 1024
    return 64 * 1024 * 1024            # conservative (v7x-shaped) default


def _pick_bt(batch, bt_cap):
    """Largest per-step batch count <= bt_cap such that:
      (a) there are >= 2 grid steps when batch >= 2 (keeps the BlockSpec
          double-buffer pipeline overlapped and both v7x TensorCores fed), and
      (b) a divisor of `batch` (preferring an even step count) is used when it
          does not shrink the tile by more than ~2x; otherwise a non-divisor
          bt with a ragged tail block is used (Pallas clips boundary blocks).
    """
    bt_cap = max(1, min(bt_cap, batch))
    if batch >= 2:
        bt_cap = min(bt_cap, (batch + 1) // 2)
    divisors = [d for d in range(1, bt_cap + 1) if batch % d == 0]
    best_div = max(divisors) if divisors else 1
    even_divs = [d for d in divisors if (batch // d) % 2 == 0]
    best_even = max(even_divs) if even_divs else 0
    bt = best_even if (best_even and best_even * 2 >= best_div) else best_div
    if bt * 2 < bt_cap:                # awkward / prime batch: take ragged tail
        bt = bt_cap
    return bt


def _ca_block_kernel(gamma_ref, x_ref, mask_ref, o_ref):
    """Single-pass fused kernel. Blocks: x (bt, C, N), mask (bt, 1, N)."""
    x = x_ref[...]
    m = mask_ref[...]
    q = x * m                                    # MXU operands stay in input dtype

    # energy[b, c, d] = sum_n q[b, c, n] * q[b, d, n]
    # Both operands contract their lane dim (A @ A^T); Mosaic may use a
    # transposed-MXU path / vxpose here — only relevant in the compute-bound
    # regime (large C on v7x); at typical C this kernel is HBM-bandwidth-bound.
    energy = lax.dot_general(
        q, q, dimension_numbers=(((2,), (2,)), ((0,), (0,))),
        preferred_element_type=jnp.float32)      # (bt, C, C) f32

    energy = energy - jnp.max(energy, axis=-1, keepdims=True)
    e = jnp.exp(energy)
    attn = e * pl.reciprocal(jnp.sum(e, axis=-1, keepdims=True), approx=False)

    # out[b, c, n] = sum_d attn[b, c, d] * x[b, d, n]
    out = lax.dot_general(
        attn.astype(x.dtype), x,
        dimension_numbers=(((2,), (1,)), ((0,), (0,))),
        preferred_element_type=jnp.float32)      # (bt, C, N) f32

    o_ref[...] = (gamma_ref[0] * out + x.astype(jnp.float32)).astype(o_ref.dtype)


def _ca_block_kernel_ntiled(gamma_ref, x_ref, mask_ref, o_ref, energy_ref, *,
                            n_total, tn, ragged_n):
    """Two-phase N-tiled kernel. grid = (batch_steps, 2, n_tiles):
    phase 0 accumulates energy over N tiles, phase 1 applies softmax(E) @ x."""
    p = pl.program_id(1)
    n = pl.program_id(2)

    @pl.when((p == 0) & (n == 0))
    def _init():
        energy_ref[...] = jnp.zeros_like(energy_ref)

    @pl.when(p == 0)
    def _accumulate():
        x = x_ref[...]
        q = x * mask_ref[...]
        if ragged_n:
            # Last tile may extend past N: zero out-of-range columns so garbage
            # lanes cannot pollute the energy accumulator.
            col = lax.broadcasted_iota(jnp.int32, q.shape, dimension=2)
            q = jnp.where(col < (n_total - n * tn), q, jnp.zeros_like(q))
        energy_ref[...] += lax.dot_general(
            q, q, dimension_numbers=(((2,), (2,)), ((0,), (0,))),
            preferred_element_type=jnp.float32)

    @pl.when((p == 1) & (n == 0))
    def _softmax():
        e = energy_ref[...]
        e = jnp.exp(e - jnp.max(e, axis=-1, keepdims=True))
        energy_ref[...] = e * pl.reciprocal(
            jnp.sum(e, axis=-1, keepdims=True), approx=False)

    @pl.when(p == 1)
    def _apply():
        x = x_ref[...]
        attn = energy_ref[...].astype(x.dtype)
        out = lax.dot_general(
            attn, x, dimension_numbers=(((2,), (1,)), ((0,), (0,))),
            preferred_element_type=jnp.float32)
        o_ref[...] = (gamma_ref[0] * out + x.astype(jnp.float32)).astype(o_ref.dtype)


def ca_block(x, mask, gamma, *, force_bt=None, force_n_tile=None):
    """CA_Block forward. x: (B, C, H, W); mask: reshapable to (B, 1, H*W);
    gamma: shape-(1,) parameter. Returns (B, C, H, W)."""
    B, C, H, W = x.shape
    N = H * W
    dtype = x.dtype
    itemsize = jnp.dtype(dtype).itemsize

    x_flat = x.reshape(B, C, N)
    mask_flat = mask.reshape(B, 1, N).astype(dtype)
    gamma = jnp.asarray(gamma, jnp.float32).reshape(1)

    # Padded extents used ONLY for VMEM footprint accounting; HBM stays unpadded.
    sub = 16 if itemsize == 2 else (32 if itemsize == 1 else 8)
    cp = _round_up(max(C, sub), sub)
    cap = _vmem_capacity_bytes()
    # ~20% headroom for Mosaic internal scratch / semaphores / spill space
    # (v7x: ~51 of 64 MiB; v5e/v6e: ~102 of 128 MiB).
    budget = int(cap * 0.8)

    def footprint(bt, n_cols):
        ncp = _round_up(n_cols, 128)
        fp = 4 * bt * cp * ncp * itemsize        # x-in + out, double-buffered
        fp += 2 * bt * sub * ncp * itemsize      # mask, double-buffered
        fp += bt * cp * ncp * itemsize           # q (input dtype)
        fp += 2 * bt * cp * ncp * 4              # f32 GEMM result + residual add
        fp += 4 * bt * cp * cp * 4               # energy / exp / attn (f32)
        return fp + (2 << 20)                    # misc slack

    use_tiled = (force_n_tile is not None) or (footprint(1, N) > budget)

    bytes_x = B * C * N * itemsize
    bytes_mask = B * N * itemsize

    if not use_tiled:
        bt_cap = 1
        while bt_cap < B and footprint(bt_cap + 1, N) <= budget:
            bt_cap += 1
        bt = int(force_bt) if force_bt else _pick_bt(B, bt_cap)
        bt = max(1, min(bt, B))
        grid = (pl.cdiv(B, bt),)

        cost = pl.CostEstimate(
            flops=4 * B * C * C * N,
            transcendentals=B * C * C,
            bytes_accessed=2 * bytes_x + bytes_mask)

        out_flat = pl.pallas_call(
            _ca_block_kernel,
            out_shape=jax.ShapeDtypeStruct((B, C, N), dtype),
            grid_spec=pltpu.PrefetchScalarGridSpec(
                num_scalar_prefetch=0,
                grid=grid,
                in_specs=[
                    pl.BlockSpec(memory_space=pltpu.MemorySpace.SMEM),    # gamma
                    pl.BlockSpec((bt, C, N), lambda b: (b, 0, 0)),        # x
                    pl.BlockSpec((bt, 1, N), lambda b: (b, 0, 0)),        # mask
                ],
                out_specs=pl.BlockSpec((bt, C, N), lambda b: (b, 0, 0)),
            ),
            compiler_params=pltpu.CompilerParams(
                dimension_semantics=("parallel",),
                vmem_limit_bytes=budget),
            cost_estimate=cost,
        )(gamma, x_flat, mask_flat)
    else:
        # N-tiled two-phase path: one (C, N) slab + f32 temporaries exceeds the
        # VMEM budget (mainly v7x, 64 MiB/TC). Costs one extra HBM read of x,
        # which the 3.2 TB/s HBM absorbs, instead of forcing spills.
        np_pad = _round_up(N, 128)
        if force_n_tile is not None:
            tn = min(_round_up(int(force_n_tile), 128), np_pad)
        else:
            tn = 128
            while tn * 2 <= np_pad and footprint(1, tn * 2) <= budget:
                tn *= 2
        n_tiles = pl.cdiv(N, tn)
        ragged_n = (N % tn) != 0

        bt_cap = 1
        while bt_cap < B and footprint(bt_cap + 1, tn) <= budget:
            bt_cap += 1
        bt = int(force_bt) if force_bt else _pick_bt(B, bt_cap)
        bt = max(1, min(bt, B))
        grid = (pl.cdiv(B, bt), 2, n_tiles)

        cost = pl.CostEstimate(
            flops=4 * B * C * C * N,
            transcendentals=B * C * C,
            bytes_accessed=3 * bytes_x + 2 * bytes_mask)

        kernel = functools.partial(
            _ca_block_kernel_ntiled, n_total=N, tn=tn, ragged_n=ragged_n)

        out_flat = pl.pallas_call(
            kernel,
            out_shape=jax.ShapeDtypeStruct((B, C, N), dtype),
            grid_spec=pltpu.PrefetchScalarGridSpec(
                num_scalar_prefetch=0,
                grid=grid,
                in_specs=[
                    pl.BlockSpec(memory_space=pltpu.MemorySpace.SMEM),        # gamma
                    pl.BlockSpec((bt, C, tn), lambda b, p, n: (b, 0, n)),     # x
                    pl.BlockSpec((bt, 1, tn), lambda b, p, n: (b, 0, n)),     # mask
                ],
                # During phase 0 the output block index stays pinned at n=0 so
                # no garbage tile is ever written back; phase 1 walks the tiles.
                out_specs=pl.BlockSpec((bt, C, tn), lambda b, p, n: (b, 0, n * p)),
                scratch_shapes=[pltpu.VMEM((bt, C, C), jnp.float32)],
            ),
            compiler_params=pltpu.CompilerParams(
                dimension_semantics=("parallel", "arbitrary", "arbitrary"),
                vmem_limit_bytes=budget),
            cost_estimate=cost,
        )(gamma, x_flat, mask_flat)

    return out_flat.reshape(B, C, H, W)


def ca_block_ref(x, mask, gamma):
    """Pure-JAX reference mirroring the PyTorch forward."""
    B, C, H, W = x.shape
    q = x.reshape(B, C, -1) * mask.reshape(B, 1, -1)
    energy = jnp.einsum("bcn,bdn->bcd", q, q)
    attn = jax.nn.softmax(energy, axis=-1)
    out = jnp.einsum("bcd,bdn->bcn", attn, x.reshape(B, C, -1))
    return jnp.reshape(gamma, ()) * out.reshape(B, C, H, W) + x


if __name__ == "__main__":
    key = jax.random.PRNGKey(0)
    kx, km, kx2, km2 = jax.random.split(key, 4)

    # Case 1: small shape, default single-pass fused path (2 grid steps).
    B, C, H, W = 2, 4, 16, 16
    x = jax.random.normal(kx, (B, C, H, W), dtype=jnp.float32)
    mask = (jax.random.uniform(km, (B, 1, H, W)) > 0.3).astype(jnp.float32)
    gamma = jnp.ones((1,), dtype=jnp.float32)     # nn.Parameter(torch.ones(1))

    out = jax.block_until_ready(ca_block(x, mask, gamma))
    ref = ca_block_ref(x, mask, gamma)
    assert out.shape == (B, C, H, W)
    assert jnp.allclose(out, ref, atol=1e-3, rtol=1e-3), "single-pass mismatch"

    # Case 2: exercise the N-tiled two-phase path with a ragged N tail
    # (N = 150, tiles of 128) and a ragged batch tail (B=3, bt=2).
    B2, C2, H2, W2 = 3, 8, 10, 15
    x2 = jax.random.normal(kx2, (B2, C2, H2, W2), dtype=jnp.float32)
    mask2 = (jax.random.uniform(km2, (B2, 1, H2, W2)) > 0.5).astype(jnp.float32)
    gamma2 = 0.7 * jnp.ones((1,), dtype=jnp.float32)

    out2 = jax.block_until_ready(
        ca_block(x2, mask2, gamma2, force_bt=2, force_n_tile=128))
    ref2 = ca_block_ref(x2, mask2, gamma2)
    assert out2.shape == (B2, C2, H2, W2)
    assert jnp.allclose(out2, ref2, atol=1e-3, rtol=1e-3), "tiled mismatch"

    print("KERNEL_OK")
</pallas_src>

<mosaic_0001>
module attributes {stable_mosaic.version = 11 : i64} {
  func.func @_ca_block_kernel(%arg0: i32, %arg1: memref<1xf32, #tpu.memory_space<smem>>, %arg2: memref<1x4x256xf32, #tpu.memory_space<vmem>>, %arg3: memref<1x1x256xf32, #tpu.memory_space<vmem>>, %arg4: memref<1x4x256xf32, #tpu.memory_space<vmem>>) attributes {dimension_semantics = [#tpu.dimension_semantics<parallel>], iteration_bounds = array<i64: 2>, scalar_prefetch = 0 : i64, scratch_operands = 0 : i64, tpu.core_type = #tpu.core_type<tc>, window_params = [{transform_indices = @transform_0, window_bounds = array<i64: 1>}, {transform_indices = @transform_1, window_bounds = array<i64: 1, 4, 256>}, {transform_indices = @transform_2, window_bounds = array<i64: 1, 1, 256>}, {transform_indices = @transform_3, window_bounds = array<i64: 1, 4, 256>}]} {
    %c0 = arith.constant 0 : index
    %c0_0 = arith.constant 0 : index
    %c0_1 = arith.constant 0 : index
    %0 = vector.load %arg2[%c0, %c0_0, %c0_1] : memref<1x4x256xf32, #tpu.memory_space<vmem>>, vector<1x4x256xf32>
    %c0_2 = arith.constant 0 : index
    %c0_3 = arith.constant 0 : index
    %c0_4 = arith.constant 0 : index
    %1 = vector.load %arg3[%c0_2, %c0_3, %c0_4] : memref<1x1x256xf32, #tpu.memory_space<vmem>>, vector<1x1x256xf32>
    %2 = vector.broadcast %1 : vector<1x1x256xf32> to vector<1x4x256xf32>
    %3 = arith.mulf %0, %2 : vector<1x4x256xf32>
    %cst = arith.constant dense<0.000000e+00> : vector<1x4x4xf32>
    %4 = tpu.matmul %3, %3, %cst {dimension_numbers = #tpu.dot_dimension_numbers<[2], [2], [1], [1], [0, 0, 0, 1, 1, 1], [0], [0]>} : vector<1x4x256xf32>, vector<1x4x256xf32>, vector<1x4x4xf32> -> vector<1x4x4xf32>
    %cst_5 = arith.constant dense<0xFF800000> : vector<1x4xf32>
    %5 = vector.multi_reduction <maximumf>, %4, %cst_5 [2] : vector<1x4x4xf32> to vector<1x4xf32>
    %6 = vector.shape_cast %5 : vector<1x4xf32> to vector<1x4x1xf32>
    %7 = vector.broadcast %6 : vector<1x4x1xf32> to vector<1x4x4xf32>
    %8 = arith.subf %4, %7 : vector<1x4x4xf32>
    %9 = math.exp %8 : vector<1x4x4xf32>
    %cst_6 = arith.constant dense<0.000000e+00> : vector<1x4xf32>
    %10 = vector.multi_reduction <add>, %9, %cst_6 [2] : vector<1x4x4xf32> to vector<1x4xf32>
    %11 = vector.shape_cast %10 : vector<1x4xf32> to vector<1x4x1xf32>
    %12 = tpu.reciprocal %11 : vector<1x4x1xf32> -> vector<1x4x1xf32>
    %13 = vector.broadcast %12 : vector<1x4x1xf32> to vector<1x4x4xf32>
    %14 = arith.mulf %9, %13 : vector<1x4x4xf32>
    %cst_7 = arith.constant dense<0.000000e+00> : vector<1x4x256xf32>
    %15 = tpu.matmul %14, %0, %cst_7 {dimension_numbers = #tpu.dot_dimension_numbers<[2], [1], [1], [2], [0, 0, 0, 1, 1, 2], [0], [0]>} : vector<1x4x4xf32>, vector<1x4x256xf32>, vector<1x4x256xf32> -> vector<1x4x256xf32>
    %c0_8 = arith.constant 0 : index
    %16 = memref.load %arg1[%c0_8] : memref<1xf32, #tpu.memory_space<smem>>
    %17 = vector.broadcast %16 : f32 to vector<1x4x256xf32>
    %18 = arith.mulf %17, %15 : vector<1x4x256xf32>
    %19 = arith.addf %18, %0 : vector<1x4x256xf32>
    %c0_9 = arith.constant 0 : index
    %c0_10 = arith.constant 0 : index
    %c0_11 = arith.constant 0 : index
    %20 = vector.load %arg4[%c0_9, %c0_10, %c0_11] : memref<1x4x256xf32, #tpu.memory_space<vmem>>, vector<1x4x256xf32>
    tpu.vector_store %arg4[%c0_9, %c0_10, %c0_11], %19 {strides = array<i32>} : memref<1x4x256xf32, #tpu.memory_space<vmem>>, vector<1x4x256xf32>,
    return
  }
  func.func @transform_0(%arg0: i32) -> i32 {
    %c0_i32 = arith.constant 0 : i32
    %c0_i32_0 = arith.constant 0 : i32
    return %c0_i32 : i32
  }
  func.func @transform_1(%arg0: i32) -> (i32, i32, i32) {
    %c0_i32 = arith.constant 0 : i32
    %c0_i32_0 = arith.constant 0 : i32
    %c0_i32_1 = arith.constant 0 : i32
    return %arg0, %c0_i32, %c0_i32_0 : i32, i32, i32
  }
  func.func @transform_2(%arg0: i32) -> (i32, i32, i32) {
    %c0_i32 = arith.constant 0 : i32
    %c0_i32_0 = arith.constant 0 : i32
    %c0_i32_1 = arith.constant 0 : i32
    return %arg0, %c0_i32, %c0_i32_0 : i32, i32, i32
  }
  func.func @transform_3(%arg0: i32) -> (i32, i32, i32) {
    %c0_i32 = arith.constant 0 : i32
    %c0_i32_0 = arith.constant 0 : i32
    %c0_i32_1 = arith.constant 0 : i32
    return %arg0, %c0_i32, %c0_i32_0 : i32, i32, i32
  }
}

</mosaic_0001>

<bundles_post_ra>
// kernel: tpu_custom_call.1
= control target key start
LH: loop header
LB: loop body
LE: loop exit
PB: predicated region body
PF: predicated region fallthrough
CT: control target
= control target key end

     0   :  { %s861_s0 = inlined_call_operand.<no memory space> [shape: f32[1], index: 0, kind: input, shape index: {}]   ;;  %s862_s1 = inlined_call_operand.hbm [shape: f32[2,4,256], index: 1, kind: input, shape index: {}]   ;;  %s863_s2 = inlined_call_operand.vmem [shape: f32[2,1,256], index: 2, kind: input, shape index: {}]   ;;  %s864_s3 = inlined_call_operand.hbm [shape: f32[2,4,256], index: 3, kind: output, shape index: {}]  }
   0x1   :  { %8 = sst [smem:[#allocation2]] %s861_s0 }
   0x2   :  { %9 = vsyncpa [#allocation4], 0 }
   0x3   :  { %11 = vsyncpa [#allocation4 + $0x1], 0 }
   0x4   :  { %12 = vsyncpa [#allocation5], 0 }
   0x5   :  { %14 = vsyncpa [#allocation5 + $0x1], 0  ;;  %s691_s14 = smov 0   ;;  %s693_s15 = smov 0  }
   0x6   :  { %s695_s16 = smov 0   ;;  %s697_s17 = smov 0  }
   0x7 LB: > { %s712_s0 = sadd.s32 4294967295, %s663_s17   ;;  %s495_s18 = sadd.s32 4294967294, %s663_s17   ;;  %s663_s17 = sphi %s697_s17, %s879_s17   ;;  %s659_s16 = sphi %s695_s16, %s878_s16   ;;  %s655_s15 = sphi %s693_s15, %s877_s15   ;;  %s651_s14 = sphi %s691_s14, %s876_s14  }
   0x8   : > { %s716_s19 = sadd.s32 1, %s663_s17   ;;  %s48_s20 = sadd.s32 1, %s659_s16 }
   0x9   : > { %s45_s21 = ssub.s32 %s663_s17, %s716_s19  ;;  %p55_p0 = scmp.ne.s32.totalorder %s659_s16, %s655_s15 }
   0xa   : > { %p46_p1 = scmp.eq.s32.totalorder %s45_s21, 0  ;;  %p56_p2 = scmp.eq.s32.totalorder %s663_s17, 0 }
   0xb   : > { %p61_p3 = scmp.ne.s32.totalorder %s655_s15, %s651_s14  ;;  %p62_p4 = scmp.eq.s32.totalorder %s712_s0, 0 }
   0xc   : > { %s728_s22 = scalar_select %p46_p1, %s659_s16, %s48_s20  }
   0xd   : > { %p730_p5 = por %p56_p2, %p55_p0  ;;  %p734_p6 = por %p62_p4, %p61_p3 }
   0xe   : > { %p111_p7 = scmp.eq.s32.totalorder %s712_s0, 1  ;;  %p117_p8 = scmp.eq.s32.totalorder %s495_s18, 1 }
   0xf   : > { %p527_p10 = scmp.lt.s32.totalorder %s663_s17, 2  ;;  %s140_s27 = sand.u32 1, %s659_s16  }
  0x10   : > { %p741_p11 = por %p111_p7, %p55_p0  ;;  %p745_p12 = por %p117_p8, %p61_p3 }
  0x11   : > { %s513_s28 = sshll.u32 %s663_s17, 7  ;;  %s498_s29 = sshll.u32 %s140_s27, 3 }
  0x12   : > { %s868_s25 = scalar_select %p741_p11, 1, 0 }
  0x13   : > { %s869_s26 = scalar_select %p745_p12, 1, 0 }
  0x14   : > { %s754_s5 = scalar_lea.hbm %s862_s1, %s513_s28  ;;  %s144_s6 = scalar_lea.vmem [#allocation3], %s498_s29 }
  0x15   : > { %s152_s7 = sshll.u32 %s144_s6, 4  ;;  %p758_p13 = pnand %p527_p10, %p730_p5  ;;  %s762_s7 = int_to_ptr.vmem [resolvable:$true] %s152_s7 }
  0x16   : > { %s141_s9 = scalar_lea.sflag [#allocation4], %s140_s27  ;;  %s567_s10 = scalar_lea.hbm %s754_s5, 128 }
  0x17   : > { %p568_p2 = scmp.ne.s32.totalorder %s754_s5, %s567_s10  ;;  %p569_p3 = pneg %p758_p13 }
  0x18   : > { %s572_s13 = scalar_lea.hbm %s862_s1, 256  ;;  %p573_p5 = scmp.lt.u32.totalorder %s754_s5, %s862_s1 }
  0x19   : > { %p570_p4 = pnand %p569_p3, %p568_p2  ;;  %p574_p8 = scmp.lt.u32.totalorder %s572_s13, %s567_s10 }
  0x1a   : > { %p576_p9 = scmp.lt.u32.totalorder %s567_s10, %s754_s5 }
  0x1b   : > { %p571_p7 = pneg %p570_p4  ;;  %p575_p10 = por %p574_p8, %p573_p5 }
  0x1d   : > { %p577_p0 = por %p576_p9, %p575_p10 }
  0x1f   : > { %p578_p1 = pnand %p577_p0, %p571_p7 }
  0x21   : > { %581 = shalt.err (!%p578_p1)
}
  0x22   : > { %s582_s21 = scalar_lea.vmem %s762_s7, 128  ;;  %s665_s23 = smov [#allocation3]  }
  0x23   : > { %p583_p2 = scmp.ne.s32.totalorder %s762_s7, %s582_s21  ;;  %s587_s27 = sshll.u32 %s665_s23, 4  ;;  %s588_s27 = int_to_ptr.vmem [resolvable:$false] %s587_s27 }
  0x24   : > { %s589_s28 = scalar_lea.vmem %s588_s27, 256  ;;  %p590_p11 = scmp.lt.s32.totalorder %s762_s7, %s588_s27 }
  0x25   : > { %p585_p4 = pnand %p583_p2, %p569_p3  ;;  %p591_p5 = scmp.lt.s32.totalorder %s589_s28, %s582_s21 }
  0x27   : > { %p586_p12 = pneg %p585_p4  ;;  %p592_p8 = por %p591_p5, %p590_p11 }
  0x29   : > { %p593_p9 = pnand %p592_p8, %p586_p12 }
  0x2b   : > { %596 = shalt.err (!%p593_p9)
}
  0x2c   : > { %522 = dma.hbm_to_vmem [thread:$0]  (!%p758_p13), %s754_s5, 128, %s762_s7, %s141_s9  }
  0x2d   : > { %p871_p0 = scmp.lt.s32.totalorder %s663_s17, 3  ;;  %p872_p1 = scmp.ge.s32.totalorder %s663_s17, 1 }
  0x2f   : > { %p165_p3 = pnand %p872_p1, %p871_p0 }
  0x30   : > { %s796_s29 = sand.u32 (!%p165_p3), 1, %s655_s15  }
  0x31   : > { %168 = sbr.rel (%p165_p3) target bundleno = 835 (0x343), region = 32  ;;  %s502_s30 = sshll.u32 (!%p165_p3), %s796_s29, 3 }
  0x32   : > { %s171_s4 = scalar_lea.sflag (!%p165_p3), [#allocation4], %s796_s29  ;;  %s174_s6 = scalar_lea.vmem (!%p165_p3), [#allocation3], %s502_s30 }
  0x38   : > { %642 = dma.done.wait (%p734_p6), %s171_s4, 128  }
  0x39   : > { %644 = vsyncadd (%p734_p6), %s171_s4, 4294967168  ;;  %p201_p11 = scmp.lt.s32.totalorder %s712_s0, 1  ;;  %v208_v0 = vlaneseq  ;;  %v205_v7 = vld [vmem:[%s174_s6] sm:$0xff]  ;;  %vm292_vm0 = vcmask 27648   ;;  %vm310_vm1 = vcmask 1043456   ;;  %v666_v20 = vmov 0.0  }
  0x3a   : > { %v305_v19 = vcombine.high %v205_v7, %v205_v7  ;;  %379 = vmatprep.mubr.f32.mxu1 %v666_v20  ;;  %vm306_vm2 = vcmask 31744   ;;  %s386_s24 = sld [smem:[#allocation2]]  ;;  %s514_s11 = sshll.u32 %s712_s0, 7 }
  0x3b   : > { %s202_s5 = scalar_select %p201_p11, %s712_s0, 1  ;;  %v209_v1 = vshrl.u32 %v208_v0, 7 }
  0x3c   : > { %505 = vmatprep.subr.msk.mxu1 %vm310_vm1, %v305_v19  ;;  %s200_s12 = scalar_lea.vmem [#allocation6], %s502_s30  ;;  %s817_s21 = scalar_lea.hbm %s864_s3, %s514_s11 }
  0x3d   : > { %s504_s7 = sshll.u32 %s202_s5, 1  ;;  %v210_v2 = vsub.s32 0, %v209_v1  ;;  %v214_v3 = vsub.s32 1, %v209_v1  ;;  %506 = vmatpush1.msk.msra.mxu1 %vm310_vm1, %v205_v7  ;;  %s413_s13 = sshll.u32 %s200_s12, 4  ;;  %s819_s13 = int_to_ptr.vmem [resolvable:$true] %s413_s13 }
  0x3e   : > { %s204_s10 = scalar_lea.vmem %s863_s2, %s504_s7  ;;  %s399_s23 = scalar_lea.sflag [#allocation5], %s796_s29 }
  0x3f   : > { %v206_v4 = vld [vmem:[%s204_s10] sm:$0x3]  ;;  %s597_s27 = scalar_lea.vmem %s819_s13, 128  ;;  %p873_p12 = scmp.ne.s32.totalorder %s868_s25, 0 }
  0x40   : > { %v211_v5 = vrot.slane %v206_v4, %v210_v2  ;;  %v215_v6 = vrot.slane %v206_v4, %v214_v3  ;;  %v387_v24 = vstv %s386_s24  ;;  %p598_p6 = scmp.ne.s32.totalorder %s819_s13, %s597_s27  ;;  %s667_s0 = smov [#allocation6]  }
  0x41   : > { %s601_s28 = sshll.u32 %s667_s0, 4  ;;  %s602_s28 = int_to_ptr.vmem [resolvable:$false] %s601_s28 }
  0x42   : > { %v216_v8 = vcombine.low %v211_v5, %v215_v6  ;;  %p599_p13 = pnand %p598_p6, %p873_p12  ;;  %s603_s30 = scalar_lea.vmem %s602_s28, 256 }
  0x43   : > { %p604_p10 = scmp.lt.s32.totalorder %s819_s13, %s602_s28  ;;  %p605_p2 = scmp.lt.s32.totalorder %s603_s30, %s597_s27 }
  0x44   : > { %v218_v9 = vmul.f32 %v216_v8, %v205_v7  ;;  %p600_p7 = pneg %p599_p13 }
  0x45   : > { %p606_p4 = por %p605_p2, %p604_p10 }
  0x46   : > { %v220_v10 = vcombine.high %v218_v9, %v218_v9 }
  0x47   : > { %p607_p5 = pnand %p606_p4, %p600_p7 }
  0x48   : > { %222 = vmatprep.subr.mxu0 %v220_v10  ;;  %286 = vmatprep.mubr.f32.mxu0 %v220_v10 }
  0x49   : > { %223 = vmatpush1.xpose.msra.mxu0 %v218_v9 }
  0x4c   : > { %287 = vmatmul.mubr.f32.vlgmr.msra.gmra.mrb[0].mxu0 %v218_v9 }
 0x11f   : > { %v288_v11 = vpop.f32.mrb[0].mxu0 }
 0x120   : > { %v290_v12 = vpop.f32.mrb[1].mxu0  ;;  %v293_v13 = vsel %vm292_vm0, %v288_v11, -inf }
 0x121   : > { %294 = vmax.xlane.f32.xlu0 %v293_v13 }
 0x1ae   : > { %v295_v14 = vpop.xlane.xlu0 %294 }
 0x1af   : > { %v296_v15 = vsub.f32 %v288_v11, %v295_v14 }
 0x1b1   : > { %v297_v16 = vmul.f32 1.442695, %v296_v15 }
 0x1b3   : > { %563 = vpow2.f32 %v297_v16 }
 0x1bd   : > { %v564_v17 = vpop.eup %563 }
 0x1be   : > { %v299_v18 = vsel %vm292_vm0, %v564_v17, 0.0 }
 0x1bf   : > { %300 = vadd.xlane.f32.xlu0 %v299_v18 }
 0x24c   : > { %v301_v21 = vpop.xlane.xlu0 %300 }
 0x24d   : > { %565 = vrcp.f32 %v301_v21 }
 0x257   : > { %v566_v22 = vpop.eup %565 }
 0x258   : > { %v303_v23 = vmul.f32 %v566_v22, %v564_v17 }
 0x25a   : > { %507 = vmatmul.mubr.msk.f32.vlgmr.msra.gmra.mrb[0].mxu1 %vm306_vm2, %v303_v23 }
 0x32d   : > { %v381_v25 = vpop.f32.mrb[0].mxu1 }
 0x32e   : > { %v388_v26 = vmul.f32 %v387_v24, %v381_v25  ;;  %v383_v27 = vpop.f32.mrb[1].mxu1 }
 0x32f   : > { %v389_v28 = vmul.f32 %v387_v24, %v383_v27 }
 0x330   : > { %v391_v29 = vadd.f32 %v388_v26, %v205_v7 }
 0x331   : > { %v392_v30 = vadd.f32 %v389_v28, %v305_v19 }
 0x333   : > { %v395_v31 = vcombine.low %v391_v29, %v392_v30 }
 0x335   : > { %397 = vst [vmem:[%s200_s12] sm:$0xff] %v395_v31 }
 0x336   : > { %610 = shalt.err (!%p607_p5)
}
 0x337   : > { %s611_s29 = scalar_lea.hbm %s817_s21, 128  ;;  %s615_s5 = scalar_lea.hbm %s864_s3, 256 }
 0x338   : > { %p612_p8 = scmp.ne.s32.totalorder %s817_s21, %s611_s29  ;;  %p616_p1 = scmp.lt.u32.totalorder %s817_s21, %s864_s3 }
 0x339   : > { %p617_p3 = scmp.lt.u32.totalorder %s615_s5, %s611_s29  ;;  %p619_p6 = scmp.lt.u32.totalorder %s611_s29, %s817_s21 }
 0x33a   : > { %p613_p9 = pnand %p612_p8, %p873_p12 }
 0x33b   : > { %p618_p11 = por %p617_p3, %p616_p1 }
 0x33c   : > { %p614_p0 = pneg %p613_p9 }
 0x33d   : > { %p620_p13 = por %p619_p6, %p618_p11 }
 0x33f   : > { %p621_p7 = pnand %p620_p13, %p614_p0 }
 0x341   : > { %624 = shalt.err (!%p621_p7)
}
 0x342   : > { %517 = dma.vmem_to_hbm [thread:$0]  (%p873_p12), %s819_s13, 128, %s817_s21, %s399_s23  }
 0x343 PF: > { %s425_s9 = sand.u32 1, %s651_s14   ;;  %p874_p10 = scmp.ne.s32.totalorder %s869_s26, 0 }
 0x344   : > { %p875_p2 = scmp.ge.s32.totalorder %s663_s17, 2  ;;  %s426_s10 = scalar_lea.sflag [#allocation5], %s425_s9 }
 0x346   : > { %p524_p4 = pnand %p875_p2, %p874_p10 }
 0x348   : > { %646 = dma.done.wait (!%p524_p4), %s426_s10, 128  }
 0x349   : > { %648 = vsyncadd (!%p524_p4), %s426_s10, 4294967168  ;;  %p17_p5 = scmp.ge.s32.totalorder %s716_s19, 4   ;;  %s876_s14 = smov %s655_s15 }
 0x34a   : > { %s877_s15 = smov %s659_s16  ;;  %s878_s16 = smov %s728_s22 }
 0x34b   : > { %s879_s17 = smov %s716_s19  ;;  %19 = sbr.rel (!%p17_p5) target bundleno = 7 (0x7), region = 80 }
 0x352   :  { %431 = vsyncpa [#allocation4], 1 }
 0x353   :  { %433 = vsyncpa [#allocation4 + $0x1], 1 }
 0x354   :  { %434 = vsyncpa [#allocation5], 1 }
 0x355   :  { %436 = vsyncpa [#allocation5 + $0x1], 1 }

</bundles_post_ra>
